<compile_context>
chip_gen: v5e
topology: v5e:2x2
jax: 0.10.0
libtpu: 0.0.40
codegen_flags: <defaults>
</compile_context>

<pallas_src>
import functools

import jax
import jax.numpy as jnp
import numpy as np
from jax import lax
from jax.experimental import pallas as pl
from jax.experimental.pallas import tpu as pltpu


def _nt_matmul(a, b):
    """Batched a @ b^T, contracting the last dim of both (no k^T materialized)."""
    return lax.dot_general(
        a, b,
        dimension_numbers=(((2,), (2,)), ((0,), (0,))),
        preferred_element_type=jnp.float32)


def _nn_matmul(a, b):
    """Batched (B,S,T) @ (B,T,D) -> (B,S,D)."""
    return lax.dot_general(
        a, b,
        dimension_numbers=(((2,), (1,)), ((0,), (0,))),
        preferred_element_type=jnp.float32)


def _softmax_lastdim(x):
    m = jnp.max(x, axis=-1, keepdims=True)
    e = jnp.exp(x - m)
    # Exact reciprocal keeps the 1e-5 tolerance vs. the f32 reference.
    return e * pl.reciprocal(jnp.sum(e, axis=-1, keepdims=True), approx=False)


def cross_modal_attention_kernel(
    f1_ref, f2_ref, f3_ref,
    wp1_ref, bp1_ref, wp2_ref, bp2_ref, wp3_ref, bp3_ref,
    wqkv1_ref, wqkv2_ref, wqkv3_ref,
    out_ref,
):
    bt, s, d = f1_ref.shape
    m = bt * s
    mm = functools.partial(jnp.dot, preferred_element_type=jnp.float32)

    # ---- Preprocess Linear + ReLU on flattened (Bt*S, D) rows (fills MXU M axis).
    #      Dropout = identity in eval mode.
    f1p = jnp.maximum(mm(f1_ref[...].reshape(m, d), wp1_ref[...]) + bp1_ref[...], 0.0)
    f2p = jnp.maximum(mm(f2_ref[...].reshape(m, d), wp2_ref[...]) + bp2_ref[...], 0.0)
    f3p = jnp.maximum(mm(f3_ref[...].reshape(m, d), wp3_ref[...]) + bp3_ref[...], 0.0)

    # ---- Packed Q/K/V projection: one (M,D)x(D,3D) matmul per modality (9 -> 3).
    qkv1 = mm(f1p, wqkv1_ref[...].astype(f1p.dtype))
    qkv2 = mm(f2p, wqkv2_ref[...].astype(f2p.dtype))
    qkv3 = mm(f3p, wqkv3_ref[...].astype(f3p.dtype))

    def split_qkv(qkv):
        q = qkv[:, 0 * d:1 * d].reshape(bt, s, d)
        k = qkv[:, 1 * d:2 * d].reshape(bt, s, d)
        v = qkv[:, 2 * d:3 * d].reshape(bt, s, d)
        return q, k, v

    q1, k1, v1 = split_qkv(qkv1)
    q2, k2, v2 = split_qkv(qkv2)
    q3, k3, v3 = split_qkv(qkv3)

    # ---- Cross-modal attention (matches the PyTorch formulas exactly):
    #   s1 = q2@k1^T + q3@k1^T == (q2+q3)@k1^T       (fused: 1 matmul + 1 VPU add)
    #   s2 = q1@k3^T + q3@k2^T                        (q1@k3^T CSE'd with s3)
    #   s3 = q1@k3^T + q2@k3^T
    g13 = _nt_matmul(q1, k3)
    s1 = _nt_matmul(q2 + q3, k1)
    s2 = g13 + _nt_matmul(q3, k2)
    s3 = g13 + _nt_matmul(q2, k3)

    u1 = _nn_matmul(_softmax_lastdim(s1), v1)
    u2 = _nn_matmul(_softmax_lastdim(s2), v2)
    u3 = _nn_matmul(_softmax_lastdim(s3), v3)

    # ---- Direct per-piece stores into the (Bt, 6, S, D) output block (no concat copy).
    odt = out_ref.dtype
    out_ref[:, 0] = u1.astype(odt)
    out_ref[:, 1] = u2.astype(odt)
    out_ref[:, 2] = u3.astype(odt)
    out_ref[:, 3] = f1p.reshape(bt, s, d).astype(odt)
    out_ref[:, 4] = f2p.reshape(bt, s, d).astype(odt)
    out_ref[:, 5] = f3p.reshape(bt, s, d).astype(odt)


def _pick_block_b(B, S, target_rows=256, max_rows=1024):
    """Largest divisor Bt of B with Bt*S rows filling the MXU M axis, while keeping
    >=2 grid steps (v7x megacore) when B > 1.  Bt > 1 only if S is sublane-aligned."""
    if S % 8 != 0:
        return 1
    best = 1
    for bt in range(1, B + 1):
        if B % bt:
            continue
        if bt * S > max_rows:
            break
        if B > 1 and B // bt < 2:
            continue
        best = bt
        if bt * S >= target_rows:
            break
    return best


def _vmem_estimate_bytes(block_b, S, D, weight_itemsize):
    w = (3 * D * D + 3 * D * 3 * D) * weight_itemsize + 3 * D * 4   # resident weights + biases
    io = (3 * block_b * S * D + block_b * 6 * S * D) * 4            # input + output blocks
    inter = block_b * (3 * S * 3 * D + 9 * S * D + 4 * S * S) * 4   # qkv / q,k,v / scores
    return w + 2 * io + inter                                       # io double-buffered


def cross_modal_attention(f1, f2, f3, params, *, block_b=None, weight_dtype=None):
    B, S, D = f1.shape
    (wp1, bp1, wp2, bp2, wp3, bp3,
     wq1, wk1, wv1, wq2, wk2, wv2, wq3, wk3, wv3) = params

    # Pack Q/K/V weights per modality -> (D, 3D) for one wide MXU matmul each.
    wqkv1 = jnp.concatenate([wq1, wk1, wv1], axis=1)
    wqkv2 = jnp.concatenate([wq2, wk2, wv2], axis=1)
    wqkv3 = jnp.concatenate([wq3, wk3, wv3], axis=1)

    if weight_dtype is not None:
        # Optional bf16 weights (halves weight VMEM/HBM traffic, doubles MXU rate);
        # default stays f32 to preserve the module's numerics at 1e-5 tolerance.
        cast = lambda w: w.astype(weight_dtype)
        wp1, wp2, wp3 = cast(wp1), cast(wp2), cast(wp3)
        wqkv1, wqkv2, wqkv3 = cast(wqkv1), cast(wqkv2), cast(wqkv3)

    if block_b is None:
        block_b = _pick_block_b(B, S)
    assert B % block_b == 0, "block_b must divide the batch size"
    grid_b = B // block_b

    # Raise the scoped VMEM limit only when the footprint demands it (cap below v7x's 64 MiB).
    w_itemsize = jnp.dtype(wqkv1.dtype).itemsize
    est = _vmem_estimate_bytes(block_b, S, D, w_itemsize)
    cp_kwargs = dict(dimension_semantics=("parallel",))
    if est > 30 * (1 << 20):
        cp_kwargs["vmem_limit_bytes"] = min(int(est * 1.25), 60 * (1 << 20))
    compiler_params = pltpu.CompilerParams(**cp_kwargs)

    f_spec = pl.BlockSpec((block_b, S, D), lambda b: (b, 0, 0))
    w_spec = pl.BlockSpec((D, D), lambda b: (0, 0))        # constant index_map -> resident
    b_spec = pl.BlockSpec((1, D), lambda b: (0, 0))
    qkv_spec = pl.BlockSpec((D, 3 * D), lambda b: (0, 0))

    out4 = pl.pallas_call(
        cross_modal_attention_kernel,
        out_shape=jax.ShapeDtypeStruct((B, 6, S, D), jnp.float32),
        grid_spec=pltpu.PrefetchScalarGridSpec(
            num_scalar_prefetch=0,
            grid=(grid_b,),
            in_specs=[f_spec, f_spec, f_spec,
                      w_spec, b_spec, w_spec, b_spec, w_spec, b_spec,
                      qkv_spec, qkv_spec, qkv_spec],
            out_specs=pl.BlockSpec((block_b, 6, S, D), lambda b: (b, 0, 0, 0)),
        ),
        compiler_params=compiler_params,
    )(f1, f2, f3,
      wp1, bp1, wp2, bp2, wp3, bp3,
      wqkv1, wqkv2, wqkv3)

    # (B, 6, S, D) -> (B, S, 6D): matches torch.cat([u1,u2,u3,f1p,f2p,f3p], dim=-1).
    return jnp.transpose(out4, (0, 2, 1, 3)).reshape(B, S, 6 * D)


def cross_modal_attention_ref(f1, f2, f3, params):
    """Pure-JAX reference replicating the PyTorch forward (eval mode, no masks)."""
    (wp1, bp1, wp2, bp2, wp3, bp3,
     wq1, wk1, wv1, wq2, wk2, wv2, wq3, wk3, wv3) = params

    sm = lambda x: jax.nn.softmax(x, axis=-1)
    f1p = jax.nn.relu(f1 @ wp1 + bp1)
    f2p = jax.nn.relu(f2 @ wp2 + bp2)
    f3p = jax.nn.relu(f3 @ wp3 + bp3)
    q1, k1, v1 = f1p @ wq1, f1p @ wk1, f1p @ wv1
    q2, k2, v2 = f2p @ wq2, f2p @ wk2, f2p @ wv2
    q3, k3, v3 = f3p @ wq3, f3p @ wk3, f3p @ wv3
    kt = lambda k: jnp.swapaxes(k, -2, -1)
    u1 = sm(q2 @ kt(k1) + q3 @ kt(k1)) @ v1
    u2 = sm(q1 @ kt(k3) + q3 @ kt(k2)) @ v2
    u3 = sm(q1 @ kt(k3) + q2 @ kt(k3)) @ v3
    return jnp.concatenate([u1, u2, u3, f1p, f2p, f3p], axis=-1)


def init_params(key, d_model):
    """Kaiming-uniform-style init matching the module's shapes.

    PyTorch Linear computes x @ W.T; weights here are stored pre-transposed as
    (in_features, out_features) so the kernel does x @ W directly.
    """
    keys = jax.random.split(key, 16)
    bound_w = float(np.sqrt(6.0 / d_model))   # kaiming_uniform, gain=sqrt(2)
    bound_b = float(1.0 / np.sqrt(d_model))   # default Linear bias init

    def w(k):
        return jax.random.uniform(k, (d_model, d_model), jnp.float32, -bound_w, bound_w)

    def b(k):
        return jax.random.uniform(k, (1, d_model), jnp.float32, -bound_b, bound_b)

    wp1, wp2, wp3 = w(keys[0]), w(keys[1]), w(keys[2])
    bp1, bp2, bp3 = b(keys[3]), b(keys[4]), b(keys[5])
    wq1, wk1, wv1 = w(keys[6]), w(keys[7]), w(keys[8])
    wq2, wk2, wv2 = w(keys[9]), w(keys[10]), w(keys[11])
    wq3, wk3, wv3 = w(keys[12]), w(keys[13]), w(keys[14])
    return (wp1, bp1, wp2, bp2, wp3, bp3,
            wq1, wk1, wv1, wq2, wk2, wv2, wq3, wk3, wv3)


if __name__ == "__main__":
    B, S, D = 2, 8, 32   # batch, sequence, d_model
    key = jax.random.PRNGKey(0)
    k_f1, k_f2, k_f3, k_p = jax.random.split(key, 4)

    f1 = jax.random.normal(k_f1, (B, S, D), jnp.float32)
    f2 = jax.random.normal(k_f2, (B, S, D), jnp.float32)
    f3 = jax.random.normal(k_f3, (B, S, D), jnp.float32)
    params = init_params(k_p, D)

    out = cross_modal_attention(f1, f2, f3, params)
    out = jax.block_until_ready(out)

    ref = cross_modal_attention_ref(f1, f2, f3, params)
    assert out.shape == (B, S, 6 * D)
    np.testing.assert_allclose(np.asarray(out), np.asarray(ref),
                               rtol=1e-5, atol=1e-5)
    print("KERNEL_OK")
</pallas_src>

<mosaic_0001>
module attributes {stable_mosaic.version = 11 : i64} {
  func.func @cross_modal_attention_kernel(%arg0: i32, %arg1: memref<1x8x32xf32, #tpu.memory_space<vmem>>, %arg2: memref<1x8x32xf32, #tpu.memory_space<vmem>>, %arg3: memref<1x8x32xf32, #tpu.memory_space<vmem>>, %arg4: memref<32x32xf32, #tpu.memory_space<vmem>>, %arg5: memref<1x32xf32, #tpu.memory_space<vmem>>, %arg6: memref<32x32xf32, #tpu.memory_space<vmem>>, %arg7: memref<1x32xf32, #tpu.memory_space<vmem>>, %arg8: memref<32x32xf32, #tpu.memory_space<vmem>>, %arg9: memref<1x32xf32, #tpu.memory_space<vmem>>, %arg10: memref<32x96xf32, #tpu.memory_space<vmem>>, %arg11: memref<32x96xf32, #tpu.memory_space<vmem>>, %arg12: memref<32x96xf32, #tpu.memory_space<vmem>>, %arg13: memref<1x6x8x32xf32, #tpu.memory_space<vmem>>) attributes {dimension_semantics = [#tpu.dimension_semantics<parallel>], iteration_bounds = array<i64: 2>, scalar_prefetch = 0 : i64, scratch_operands = 0 : i64, tpu.core_type = #tpu.core_type<tc>, window_params = [{transform_indices = @transform_0, window_bounds = array<i64: 1, 8, 32>}, {transform_indices = @transform_1, window_bounds = array<i64: 1, 8, 32>}, {transform_indices = @transform_2, window_bounds = array<i64: 1, 8, 32>}, {pipeline_mode = #tpu.pipeline_mode<synchronous>, transform_indices = @transform_3, window_bounds = array<i64: 32, 32>}, {pipeline_mode = #tpu.pipeline_mode<synchronous>, transform_indices = @transform_4, window_bounds = array<i64: 1, 32>}, {pipeline_mode = #tpu.pipeline_mode<synchronous>, transform_indices = @transform_5, window_bounds = array<i64: 32, 32>}, {pipeline_mode = #tpu.pipeline_mode<synchronous>, transform_indices = @transform_6, window_bounds = array<i64: 1, 32>}, {pipeline_mode = #tpu.pipeline_mode<synchronous>, transform_indices = @transform_7, window_bounds = array<i64: 32, 32>}, {pipeline_mode = #tpu.pipeline_mode<synchronous>, transform_indices = @transform_8, window_bounds = array<i64: 1, 32>}, {pipeline_mode = #tpu.pipeline_mode<synchronous>, transform_indices = @transform_9, window_bounds = array<i64: 32, 96>}, {pipeline_mode = #tpu.pipeline_mode<synchronous>, transform_indices = @transform_10, window_bounds = array<i64: 32, 96>}, {pipeline_mode = #tpu.pipeline_mode<synchronous>, transform_indices = @transform_11, window_bounds = array<i64: 32, 96>}, {transform_indices = @transform_12, window_bounds = array<i64: 1, 6, 8, 32>}]} {
    %c0 = arith.constant 0 : index
    %c0_0 = arith.constant 0 : index
    %c0_1 = arith.constant 0 : index
    %0 = vector.load %arg1[%c0, %c0_0, %c0_1] : memref<1x8x32xf32, #tpu.memory_space<vmem>>, vector<1x8x32xf32>
    %1 = vector.shape_cast %0 : vector<1x8x32xf32> to vector<8x32xf32>
    %c0_2 = arith.constant 0 : index
    %c0_3 = arith.constant 0 : index
    %2 = vector.load %arg4[%c0_2, %c0_3] : memref<32x32xf32, #tpu.memory_space<vmem>>, vector<32x32xf32>
    %cst = arith.constant dense<0.000000e+00> : vector<8x32xf32>
    %3 = tpu.matmul %1, %2, %cst {dimension_numbers = #tpu.dot_dimension_numbers<[1], [0], [0], [1], [0, 0, 1, 1], [], []>} : vector<8x32xf32>, vector<32x32xf32>, vector<8x32xf32> -> vector<8x32xf32>
    %c0_4 = arith.constant 0 : index
    %c0_5 = arith.constant 0 : index
    %4 = vector.load %arg5[%c0_4, %c0_5] : memref<1x32xf32, #tpu.memory_space<vmem>>, vector<1x32xf32>
    %5 = vector.broadcast %4 : vector<1x32xf32> to vector<8x32xf32>
    %6 = arith.addf %3, %5 : vector<8x32xf32>
    %cst_6 = arith.constant 0.000000e+00 : f32
    %7 = vector.broadcast %cst_6 : f32 to vector<8x32xf32>
    %8 = arith.maximumf %6, %7 : vector<8x32xf32>
    %c0_7 = arith.constant 0 : index
    %c0_8 = arith.constant 0 : index
    %c0_9 = arith.constant 0 : index
    %9 = vector.load %arg2[%c0_7, %c0_8, %c0_9] : memref<1x8x32xf32, #tpu.memory_space<vmem>>, vector<1x8x32xf32>
    %10 = vector.shape_cast %9 : vector<1x8x32xf32> to vector<8x32xf32>
    %c0_10 = arith.constant 0 : index
    %c0_11 = arith.constant 0 : index
    %11 = vector.load %arg6[%c0_10, %c0_11] : memref<32x32xf32, #tpu.memory_space<vmem>>, vector<32x32xf32>
    %cst_12 = arith.constant dense<0.000000e+00> : vector<8x32xf32>
    %12 = tpu.matmul %10, %11, %cst_12 {dimension_numbers = #tpu.dot_dimension_numbers<[1], [0], [0], [1], [0, 0, 1, 1], [], []>} : vector<8x32xf32>, vector<32x32xf32>, vector<8x32xf32> -> vector<8x32xf32>
    %c0_13 = arith.constant 0 : index
    %c0_14 = arith.constant 0 : index
    %13 = vector.load %arg7[%c0_13, %c0_14] : memref<1x32xf32, #tpu.memory_space<vmem>>, vector<1x32xf32>
    %14 = vector.broadcast %13 : vector<1x32xf32> to vector<8x32xf32>
    %15 = arith.addf %12, %14 : vector<8x32xf32>
    %cst_15 = arith.constant 0.000000e+00 : f32
    %16 = vector.broadcast %cst_15 : f32 to vector<8x32xf32>
    %17 = arith.maximumf %15, %16 : vector<8x32xf32>
    %c0_16 = arith.constant 0 : index
    %c0_17 = arith.constant 0 : index
    %c0_18 = arith.constant 0 : index
    %18 = vector.load %arg3[%c0_16, %c0_17, %c0_18] : memref<1x8x32xf32, #tpu.memory_space<vmem>>, vector<1x8x32xf32>
    %19 = vector.shape_cast %18 : vector<1x8x32xf32> to vector<8x32xf32>
    %c0_19 = arith.constant 0 : index
    %c0_20 = arith.constant 0 : index
    %20 = vector.load %arg8[%c0_19, %c0_20] : memref<32x32xf32, #tpu.memory_space<vmem>>, vector<32x32xf32>
    %cst_21 = arith.constant dense<0.000000e+00> : vector<8x32xf32>
    %21 = tpu.matmul %19, %20, %cst_21 {dimension_numbers = #tpu.dot_dimension_numbers<[1], [0], [0], [1], [0, 0, 1, 1], [], []>} : vector<8x32xf32>, vector<32x32xf32>, vector<8x32xf32> -> vector<8x32xf32>
    %c0_22 = arith.constant 0 : index
    %c0_23 = arith.constant 0 : index
    %22 = vector.load %arg9[%c0_22, %c0_23] : memref<1x32xf32, #tpu.memory_space<vmem>>, vector<1x32xf32>
    %23 = vector.broadcast %22 : vector<1x32xf32> to vector<8x32xf32>
    %24 = arith.addf %21, %23 : vector<8x32xf32>
    %cst_24 = arith.constant 0.000000e+00 : f32
    %25 = vector.broadcast %cst_24 : f32 to vector<8x32xf32>
    %26 = arith.maximumf %24, %25 : vector<8x32xf32>
    %c0_25 = arith.constant 0 : index
    %c0_26 = arith.constant 0 : index
    %27 = vector.load %arg10[%c0_25, %c0_26] : memref<32x96xf32, #tpu.memory_space<vmem>>, vector<32x96xf32>
    %cst_27 = arith.constant dense<0.000000e+00> : vector<8x96xf32>
    %28 = tpu.matmul %8, %27, %cst_27 {dimension_numbers = #tpu.dot_dimension_numbers<[1], [0], [0], [1], [0, 0, 1, 1], [], []>} : vector<8x32xf32>, vector<32x96xf32>, vector<8x96xf32> -> vector<8x96xf32>
    %c0_28 = arith.constant 0 : index
    %c0_29 = arith.constant 0 : index
    %29 = vector.load %arg11[%c0_28, %c0_29] : memref<32x96xf32, #tpu.memory_space<vmem>>, vector<32x96xf32>
    %cst_30 = arith.constant dense<0.000000e+00> : vector<8x96xf32>
    %30 = tpu.matmul %17, %29, %cst_30 {dimension_numbers = #tpu.dot_dimension_numbers<[1], [0], [0], [1], [0, 0, 1, 1], [], []>} : vector<8x32xf32>, vector<32x96xf32>, vector<8x96xf32> -> vector<8x96xf32>
    %c0_31 = arith.constant 0 : index
    %c0_32 = arith.constant 0 : index
    %31 = vector.load %arg12[%c0_31, %c0_32] : memref<32x96xf32, #tpu.memory_space<vmem>>, vector<32x96xf32>
    %cst_33 = arith.constant dense<0.000000e+00> : vector<8x96xf32>
    %32 = tpu.matmul %26, %31, %cst_33 {dimension_numbers = #tpu.dot_dimension_numbers<[1], [0], [0], [1], [0, 0, 1, 1], [], []>} : vector<8x32xf32>, vector<32x96xf32>, vector<8x96xf32> -> vector<8x96xf32>
    %33 = vector.extract_strided_slice %28 {offsets = [0, 0], sizes = [8, 32], strides = [1, 1]} : vector<8x96xf32> to vector<8x32xf32>
    %34 = vector.shape_cast %33 : vector<8x32xf32> to vector<1x8x32xf32>
    %35 = vector.extract_strided_slice %28 {offsets = [0, 32], sizes = [8, 32], strides = [1, 1]} : vector<8x96xf32> to vector<8x32xf32>
    %36 = vector.shape_cast %35 : vector<8x32xf32> to vector<1x8x32xf32>
    %37 = vector.extract_strided_slice %28 {offsets = [0, 64], sizes = [8, 32], strides = [1, 1]} : vector<8x96xf32> to vector<8x32xf32>
    %38 = vector.shape_cast %37 : vector<8x32xf32> to vector<1x8x32xf32>
    %39 = vector.extract_strided_slice %30 {offsets = [0, 0], sizes = [8, 32], strides = [1, 1]} : vector<8x96xf32> to vector<8x32xf32>
    %40 = vector.shape_cast %39 : vector<8x32xf32> to vector<1x8x32xf32>
    %41 = vector.extract_strided_slice %30 {offsets = [0, 32], sizes = [8, 32], strides = [1, 1]} : vector<8x96xf32> to vector<8x32xf32>
    %42 = vector.shape_cast %41 : vector<8x32xf32> to vector<1x8x32xf32>
    %43 = vector.extract_strided_slice %30 {offsets = [0, 64], sizes = [8, 32], strides = [1, 1]} : vector<8x96xf32> to vector<8x32xf32>
    %44 = vector.shape_cast %43 : vector<8x32xf32> to vector<1x8x32xf32>
    %45 = vector.extract_strided_slice %32 {offsets = [0, 0], sizes = [8, 32], strides = [1, 1]} : vector<8x96xf32> to vector<8x32xf32>
    %46 = vector.shape_cast %45 : vector<8x32xf32> to vector<1x8x32xf32>
    %47 = vector.extract_strided_slice %32 {offsets = [0, 32], sizes = [8, 32], strides = [1, 1]} : vector<8x96xf32> to vector<8x32xf32>
    %48 = vector.shape_cast %47 : vector<8x32xf32> to vector<1x8x32xf32>
    %49 = vector.extract_strided_slice %32 {offsets = [0, 64], sizes = [8, 32], strides = [1, 1]} : vector<8x96xf32> to vector<8x32xf32>
    %50 = vector.shape_cast %49 : vector<8x32xf32> to vector<1x8x32xf32>
    %cst_34 = arith.constant dense<0.000000e+00> : vector<1x8x8xf32>
    %51 = tpu.matmul %34, %48, %cst_34 {dimension_numbers = #tpu.dot_dimension_numbers<[2], [2], [1], [1], [0, 0, 0, 1, 1, 1], [0], [0]>} : vector<1x8x32xf32>, vector<1x8x32xf32>, vector<1x8x8xf32> -> vector<1x8x8xf32>
    %52 = arith.addf %40, %46 : vector<1x8x32xf32>
    %cst_35 = arith.constant dense<0.000000e+00> : vector<1x8x8xf32>
    %53 = tpu.matmul %52, %36, %cst_35 {dimension_numbers = #tpu.dot_dimension_numbers<[2], [2], [1], [1], [0, 0, 0, 1, 1, 1], [0], [0]>} : vector<1x8x32xf32>, vector<1x8x32xf32>, vector<1x8x8xf32> -> vector<1x8x8xf32>
    %cst_36 = arith.constant dense<0.000000e+00> : vector<1x8x8xf32>
    %54 = tpu.matmul %46, %42, %cst_36 {dimension_numbers = #tpu.dot_dimension_numbers<[2], [2], [1], [1], [0, 0, 0, 1, 1, 1], [0], [0]>} : vector<1x8x32xf32>, vector<1x8x32xf32>, vector<1x8x8xf32> -> vector<1x8x8xf32>
    %55 = arith.addf %51, %54 : vector<1x8x8xf32>
    %cst_37 = arith.constant dense<0.000000e+00> : vector<1x8x8xf32>
    %56 = tpu.matmul %40, %48, %cst_37 {dimension_numbers = #tpu.dot_dimension_numbers<[2], [2], [1], [1], [0, 0, 0, 1, 1, 1], [0], [0]>} : vector<1x8x32xf32>, vector<1x8x32xf32>, vector<1x8x8xf32> -> vector<1x8x8xf32>
    %57 = arith.addf %51, %56 : vector<1x8x8xf32>
    %cst_38 = arith.constant dense<0xFF800000> : vector<1x8xf32>
    %58 = vector.multi_reduction <maximumf>, %53, %cst_38 [2] : vector<1x8x8xf32> to vector<1x8xf32>
    %59 = vector.shape_cast %58 : vector<1x8xf32> to vector<1x8x1xf32>
    %60 = vector.broadcast %59 : vector<1x8x1xf32> to vector<1x8x8xf32>
    %61 = arith.subf %53, %60 : vector<1x8x8xf32>
    %62 = math.exp %61 : vector<1x8x8xf32>
    %cst_39 = arith.constant dense<0.000000e+00> : vector<1x8xf32>
    %63 = vector.multi_reduction <add>, %62, %cst_39 [2] : vector<1x8x8xf32> to vector<1x8xf32>
    %64 = vector.shape_cast %63 : vector<1x8xf32> to vector<1x8x1xf32>
    %65 = tpu.reciprocal %64 : vector<1x8x1xf32> -> vector<1x8x1xf32>
    %66 = vector.broadcast %65 : vector<1x8x1xf32> to vector<1x8x8xf32>
    %67 = arith.mulf %62, %66 : vector<1x8x8xf32>
    %cst_40 = arith.constant dense<0.000000e+00> : vector<1x8x32xf32>
    %68 = tpu.matmul %67, %38, %cst_40 {dimension_numbers = #tpu.dot_dimension_numbers<[2], [1], [1], [2], [0, 0, 0, 1, 1, 2], [0], [0]>} : vector<1x8x8xf32>, vector<1x8x32xf32>, vector<1x8x32xf32> -> vector<1x8x32xf32>
    %cst_41 = arith.constant dense<0xFF800000> : vector<1x8xf32>
    %69 = vector.multi_reduction <maximumf>, %55, %cst_41 [2] : vector<1x8x8xf32> to vector<1x8xf32>
    %70 = vector.shape_cast %69 : vector<1x8xf32> to vector<1x8x1xf32>
    %71 = vector.broadcast %70 : vector<1x8x1xf32> to vector<1x8x8xf32>
    %72 = arith.subf %55, %71 : vector<1x8x8xf32>
    %73 = math.exp %72 : vector<1x8x8xf32>
    %cst_42 = arith.constant dense<0.000000e+00> : vector<1x8xf32>
    %74 = vector.multi_reduction <add>, %73, %cst_42 [2] : vector<1x8x8xf32> to vector<1x8xf32>
    %75 = vector.shape_cast %74 : vector<1x8xf32> to vector<1x8x1xf32>
    %76 = tpu.reciprocal %75 : vector<1x8x1xf32> -> vector<1x8x1xf32>
    %77 = vector.broadcast %76 : vector<1x8x1xf32> to vector<1x8x8xf32>
    %78 = arith.mulf %73, %77 : vector<1x8x8xf32>
    %cst_43 = arith.constant dense<0.000000e+00> : vector<1x8x32xf32>
    %79 = tpu.matmul %78, %44, %cst_43 {dimension_numbers = #tpu.dot_dimension_numbers<[2], [1], [1], [2], [0, 0, 0, 1, 1, 2], [0], [0]>} : vector<1x8x8xf32>, vector<1x8x32xf32>, vector<1x8x32xf32> -> vector<1x8x32xf32>
    %cst_44 = arith.constant dense<0xFF800000> : vector<1x8xf32>
    %80 = vector.multi_reduction <maximumf>, %57, %cst_44 [2] : vector<1x8x8xf32> to vector<1x8xf32>
    %81 = vector.shape_cast %80 : vector<1x8xf32> to vector<1x8x1xf32>
    %82 = vector.broadcast %81 : vector<1x8x1xf32> to vector<1x8x8xf32>
    %83 = arith.subf %57, %82 : vector<1x8x8xf32>
    %84 = math.exp %83 : vector<1x8x8xf32>
    %cst_45 = arith.constant dense<0.000000e+00> : vector<1x8xf32>
    %85 = vector.multi_reduction <add>, %84, %cst_45 [2] : vector<1x8x8xf32> to vector<1x8xf32>
    %86 = vector.shape_cast %85 : vector<1x8xf32> to vector<1x8x1xf32>
    %87 = tpu.reciprocal %86 : vector<1x8x1xf32> -> vector<1x8x1xf32>
    %88 = vector.broadcast %87 : vector<1x8x1xf32> to vector<1x8x8xf32>
    %89 = arith.mulf %84, %88 : vector<1x8x8xf32>
    %cst_46 = arith.constant dense<0.000000e+00> : vector<1x8x32xf32>
    %90 = tpu.matmul %89, %50, %cst_46 {dimension_numbers = #tpu.dot_dimension_numbers<[2], [1], [1], [2], [0, 0, 0, 1, 1, 2], [0], [0]>} : vector<1x8x8xf32>, vector<1x8x32xf32>, vector<1x8x32xf32> -> vector<1x8x32xf32>
    %c0_47 = arith.constant 0 : index
    %c0_48 = arith.constant 0 : index
    %c0_49 = arith.constant 0 : index
    %c0_50 = arith.constant 0 : index
    %91 = vector.load %arg13[%c0_47, %c0_48, %c0_49, %c0_50] : memref<1x6x8x32xf32, #tpu.memory_space<vmem>>, vector<1x1x8x32xf32>
    %92 = vector.shape_cast %91 : vector<1x1x8x32xf32> to vector<1x8x32xf32>
    %93 = vector.shape_cast %68 : vector<1x8x32xf32> to vector<1x1x8x32xf32>
    tpu.vector_store %arg13[%c0_47, %c0_48, %c0_49, %c0_50], %93 {strides = array<i32>} : memref<1x6x8x32xf32, #tpu.memory_space<vmem>>, vector<1x1x8x32xf32>,
    %c0_51 = arith.constant 0 : index
    %c1 = arith.constant 1 : index
    %c0_52 = arith.constant 0 : index
    %c0_53 = arith.constant 0 : index
    %94 = vector.load %arg13[%c0_51, %c1, %c0_52, %c0_53] : memref<1x6x8x32xf32, #tpu.memory_space<vmem>>, vector<1x1x8x32xf32>
    %95 = vector.shape_cast %94 : vector<1x1x8x32xf32> to vector<1x8x32xf32>
    %96 = vector.shape_cast %79 : vector<1x8x32xf32> to vector<1x1x8x32xf32>
    tpu.vector_store %arg13[%c0_51, %c1, %c0_52, %c0_53], %96 {strides = array<i32>} : memref<1x6x8x32xf32, #tpu.memory_space<vmem>>, vector<1x1x8x32xf32>,
    %c0_54 = arith.constant 0 : index
    %c2 = arith.constant 2 : index
    %c0_55 = arith.constant 0 : index
    %c0_56 = arith.constant 0 : index
    %97 = vector.load %arg13[%c0_54, %c2, %c0_55, %c0_56] : memref<1x6x8x32xf32, #tpu.memory_space<vmem>>, vector<1x1x8x32xf32>
    %98 = vector.shape_cast %97 : vector<1x1x8x32xf32> to vector<1x8x32xf32>
    %99 = vector.shape_cast %90 : vector<1x8x32xf32> to vector<1x1x8x32xf32>
    tpu.vector_store %arg13[%c0_54, %c2, %c0_55, %c0_56], %99 {strides = array<i32>} : memref<1x6x8x32xf32, #tpu.memory_space<vmem>>, vector<1x1x8x32xf32>,
    %100 = vector.shape_cast %8 : vector<8x32xf32> to vector<1x8x32xf32>
    %c0_57 = arith.constant 0 : index
    %c3 = arith.constant 3 : index
    %c0_58 = arith.constant 0 : index
    %c0_59 = arith.constant 0 : index
    %101 = vector.load %arg13[%c0_57, %c3, %c0_58, %c0_59] : memref<1x6x8x32xf32, #tpu.memory_space<vmem>>, vector<1x1x8x32xf32>
    %102 = vector.shape_cast %101 : vector<1x1x8x32xf32> to vector<1x8x32xf32>
    %103 = vector.shape_cast %100 : vector<1x8x32xf32> to vector<1x1x8x32xf32>
    tpu.vector_store %arg13[%c0_57, %c3, %c0_58, %c0_59], %103 {strides = array<i32>} : memref<1x6x8x32xf32, #tpu.memory_space<vmem>>, vector<1x1x8x32xf32>,
    %104 = vector.shape_cast %17 : vector<8x32xf32> to vector<1x8x32xf32>
    %c0_60 = arith.constant 0 : index
    %c4 = arith.constant 4 : index
    %c0_61 = arith.constant 0 : index
    %c0_62 = arith.constant 0 : index
    %105 = vector.load %arg13[%c0_60, %c4, %c0_61, %c0_62] : memref<1x6x8x32xf32, #tpu.memory_space<vmem>>, vector<1x1x8x32xf32>
    %106 = vector.shape_cast %105 : vector<1x1x8x32xf32> to vector<1x8x32xf32>
    %107 = vector.shape_cast %104 : vector<1x8x32xf32> to vector<1x1x8x32xf32>
    tpu.vector_store %arg13[%c0_60, %c4, %c0_61, %c0_62], %107 {strides = array<i32>} : memref<1x6x8x32xf32, #tpu.memory_space<vmem>>, vector<1x1x8x32xf32>,
    %108 = vector.shape_cast %26 : vector<8x32xf32> to vector<1x8x32xf32>
    %c0_63 = arith.constant 0 : index
    %c5 = arith.constant 5 : index
    %c0_64 = arith.constant 0 : index
    %c0_65 = arith.constant 0 : index
    %109 = vector.load %arg13[%c0_63, %c5, %c0_64, %c0_65] : memref<1x6x8x32xf32, #tpu.memory_space<vmem>>, vector<1x1x8x32xf32>
    %110 = vector.shape_cast %109 : vector<1x1x8x32xf32> to vector<1x8x32xf32>
    %111 = vector.shape_cast %108 : vector<1x8x32xf32> to vector<1x1x8x32xf32>
    tpu.vector_store %arg13[%c0_63, %c5, %c0_64, %c0_65], %111 {strides = array<i32>} : memref<1x6x8x32xf32, #tpu.memory_space<vmem>>, vector<1x1x8x32xf32>,
    return
  }
  func.func @transform_0(%arg0: i32) -> (i32, i32, i32) {
    %c0_i32 = arith.constant 0 : i32
    %c0_i32_0 = arith.constant 0 : i32
    %c0_i32_1 = arith.constant 0 : i32
    return %arg0, %c0_i32, %c0_i32_0 : i32, i32, i32
  }
  func.func @transform_1(%arg0: i32) -> (i32, i32, i32) {
    %c0_i32 = arith.constant 0 : i32
    %c0_i32_0 = arith.constant 0 : i32
    %c0_i32_1 = arith.constant 0 : i32
    return %arg0, %c0_i32, %c0_i32_0 : i32, i32, i32
  }
  func.func @transform_2(%arg0: i32) -> (i32, i32, i32) {
    %c0_i32 = arith.constant 0 : i32
    %c0_i32_0 = arith.constant 0 : i32
    %c0_i32_1 = arith.constant 0 : i32
    return %arg0, %c0_i32, %c0_i32_0 : i32, i32, i32
  }
  func.func @transform_3(%arg0: i32) -> (i32, i32) {
    %c0_i32 = arith.constant 0 : i32
    %c0_i32_0 = arith.constant 0 : i32
    %c0_i32_1 = arith.constant 0 : i32
    return %c0_i32, %c0_i32_0 : i32, i32
  }
  func.func @transform_4(%arg0: i32) -> (i32, i32) {
    %c0_i32 = arith.constant 0 : i32
    %c0_i32_0 = arith.constant 0 : i32
    %c0_i32_1 = arith.constant 0 : i32
    return %c0_i32, %c0_i32_0 : i32, i32
  }
  func.func @transform_5(%arg0: i32) -> (i32, i32) {
    %c0_i32 = arith.constant 0 : i32
    %c0_i32_0 = arith.constant 0 : i32
    %c0_i32_1 = arith.constant 0 : i32
    return %c0_i32, %c0_i32_0 : i32, i32
  }
  func.func @transform_6(%arg0: i32) -> (i32, i32) {
    %c0_i32 = arith.constant 0 : i32
    %c0_i32_0 = arith.constant 0 : i32
    %c0_i32_1 = arith.constant 0 : i32
    return %c0_i32, %c0_i32_0 : i32, i32
  }
  func.func @transform_7(%arg0: i32) -> (i32, i32) {
    %c0_i32 = arith.constant 0 : i32
    %c0_i32_0 = arith.constant 0 : i32
    %c0_i32_1 = arith.constant 0 : i32
    return %c0_i32, %c0_i32_0 : i32, i32
  }
  func.func @transform_8(%arg0: i32) -> (i32, i32) {
    %c0_i32 = arith.constant 0 : i32
    %c0_i32_0 = arith.constant 0 : i32
    %c0_i32_1 = arith.constant 0 : i32
    return %c0_i32, %c0_i32_0 : i32, i32
  }
  func.func @transform_9(%arg0: i32) -> (i32, i32) {
    %c0_i32 = arith.constant 0 : i32
    %c0_i32_0 = arith.constant 0 : i32
    %c0_i32_1 = arith.constant 0 : i32
    return %c0_i32, %c0_i32_0 : i32, i32
  }
  func.func @transform_10(%arg0: i32) -> (i32, i32) {
    %c0_i32 = arith.constant 0 : i32
    %c0_i32_0 = arith.constant 0 : i32
    %c0_i32_1 = arith.constant 0 : i32
    return %c0_i32, %c0_i32_0 : i32, i32
  }
  func.func @transform_11(%arg0: i32) -> (i32, i32) {
    %c0_i32 = arith.constant 0 : i32
    %c0_i32_0 = arith.constant 0 : i32
    %c0_i32_1 = arith.constant 0 : i32
    return %c0_i32, %c0_i32_0 : i32, i32
  }
  func.func @transform_12(%arg0: i32) -> (i32, i32, i32, i32) {
    %c0_i32 = arith.constant 0 : i32
    %c0_i32_0 = arith.constant 0 : i32
    %c0_i32_1 = arith.constant 0 : i32
    %c0_i32_2 = arith.constant 0 : i32
    return %arg0, %c0_i32, %c0_i32_0, %c0_i32_1 : i32, i32, i32, i32
  }
}

</mosaic_0001>

<bundles_post_ra>
// kernel: tpu_custom_call.1
= control target key start
LH: loop header
LB: loop body
LE: loop exit
PB: predicated region body
PF: predicated region fallthrough
CT: control target
= control target key end

     0   :  { %s2177_s0 = inlined_call_operand.hbm [shape: f32[2,8,32], index: 0, kind: input, shape index: {}]   ;;  %s2178_s1 = inlined_call_operand.hbm [shape: f32[2,8,32], index: 1, kind: input, shape index: {}]   ;;  %s2179_s2 = inlined_call_operand.hbm [shape: f32[2,8,32], index: 2, kind: input, shape index: {}]   ;;  %s2180_s3 = inlined_call_operand.hbm [shape: f32[32,32], index: 3, kind: input, shape index: {}]   ;;  %s2181_s4 = inlined_call_operand.vmem [shape: f32[1,32], index: 4, kind: input, shape index: {}]   ;;  %s2182_s5 = inlined_call_operand.hbm [shape: f32[32,32], index: 5, kind: input, shape index: {}]   ;;  %s2183_s6 = inlined_call_operand.vmem [shape: f32[1,32], index: 6, kind: input, shape index: {}]   ;;  %s2184_s7 = inlined_call_operand.hbm [shape: f32[32,32], index: 7, kind: input, shape index: {}]   ;;  %s2185_s8 = inlined_call_operand.vmem [shape: f32[1,32], index: 8, kind: input, shape index: {}]   ;;  %s2186_s9 = inlined_call_operand.hbm [shape: f32[32,96], index: 9, kind: input, shape index: {}]   ;;  %s2187_s10 = inlined_call_operand.hbm [shape: f32[32,96], index: 10, kind: input, shape index: {}]   ;;  %s2188_s11 = inlined_call_operand.hbm [shape: f32[32,96], index: 11, kind: input, shape index: {}]   ;;  %s2189_s12 = inlined_call_operand.hbm [shape: f32[2,6,8,32], index: 12, kind: output, shape index: {}]  }
   0x1   :  { %2204 = sst [smem:[#allocation30_spill]] %s2178_s1 }
   0x2   :  { %2205 = sst [smem:[#allocation31_spill]] %s2180_s3 }
   0x3   :  { %2206 = sst [smem:[#allocation32_spill]] %s2184_s7 }
   0x4   :  { %2207 = sst [smem:[#allocation33_spill]] %s2185_s8 }
   0x5   :  { %2208 = sst [smem:[#allocation34_spill]] %s2187_s10 }
   0x6   :  { %2209 = sst [smem:[#allocation35_spill]] %s2189_s12 }
   0x7   :  { %17 = vsyncpa [#allocation3], 0 }
   0x8   :  { %19 = vsyncpa [#allocation3 + $0x1], 0 }
   0x9   :  { %20 = vsyncpa [#allocation6], 0 }
   0xa   :  { %22 = vsyncpa [#allocation6 + $0x1], 0 }
   0xb   :  { %23 = vsyncpa [#allocation9], 0 }
   0xc   :  { %24 = vsyncpa [#allocation12], 0 }
   0xd   :  { %25 = vsyncpa [#allocation15], 0 }
   0xe   :  { %26 = vsyncpa [#allocation4], 0 }
   0xf   :  { %28 = vsyncpa [#allocation4 + $0x1], 0  ;;  %s1870_s21 = smov 0   ;;  %s1872_s22 = smov 0  }
  0x10   :  { %s1874_s23 = smov 0   ;;  %s1876_s24 = smov 0  }
  0x11 LB: > { %2210 = sst [smem:[#allocation24_spill]] %s1779_s21  ;;  %s1894_s28 = sadd.s32 4294967295, %s1791_s24   ;;  %s1791_s24 = sphi %s1876_s24, %s2242_s24   ;;  %s1787_s23 = sphi %s1874_s23, %s2246_s23   ;;  %s1783_s22 = sphi %s1872_s22, %s2245_s22   ;;  %s1779_s21 = sphi %s1870_s21, %s2244_s21  }
  0x12   : > { %2211 = sst [smem:[#allocation25_spill]] %s1791_s24  ;;  %p1245_p0 = scmp.ge.s32.totalorder %s1791_s24, 1 }
  0x13   : > { %s2212_s3 = sld [smem:[#allocation31_spill]]  ;;  %p2203_p1 = scmp.eq.s32.totalorder %s1894_s28, 0 }
  0x14   : > { %p332_p2 = scmp.lt.s32.totalorder %s1791_s24, 3  ;;  %s1793_s30 = smov [#allocation8]  }
  0x15   : > { %s345_s13 = sshll.u32 %s1793_s30, 4  ;;  %s2214_s7 = sld [smem:[#allocation32_spill]]  ;;  %s346_s13 = int_to_ptr.vmem [resolvable:$true] %s345_s13 }
  0x16   : > { %p1899_p3 = pnand %p1245_p0, %p332_p2  ;;  %s2216_s10 = sld [smem:[#allocation34_spill]] }
  0x17   : > { %s1794_s25 = smov [#allocation11]   ;;  %s2190_s30 = smov 128  }
  0x18   : > { %p1328_p4 = pneg %p1899_p3  ;;  %s379_s26 = sshll.u32 %s1794_s25, 4  ;;  %s380_s26 = int_to_ptr.vmem [resolvable:$true] %s379_s26 }
  0x19   : > { %s343_s27 = sshll.u32 %s2212_s3, 4  ;;  %s2192_s14 = smov 8   ;;  %s344_s27 = int_to_ptr.hbm [resolvable:$true] %s343_s27 }
  0x1a   : > { %p1911_p6 = pnand %p1328_p4, %p2203_p1  ;;  %s1797_s15 = smov [#allocation14]  }
  0x1b   : > { %s377_s16 = sshll.u32 %s2214_s7, 4  ;;  %s410_s18 = sshll.u32 %s1797_s15, 4  ;;  %s378_s16 = int_to_ptr.hbm [resolvable:$true] %s377_s16  ;;  %s411_s18 = int_to_ptr.vmem [resolvable:$true] %s410_s18 }
  0x1c   : > { %s408_s20 = sshll.u32 %s2216_s10, 4  ;;  %s41_s19 = sadd.s32 1, %s1787_s23  ;;  %s409_s20 = int_to_ptr.hbm [resolvable:$true] %s408_s20 }
  0x1d   : > { %1331 = dma.hbm_to_vmem [thread:$0]  (!%p1911_p6), %s344_s27, 512, %s346_s13, [#allocation9], %s2190_s30, %s2190_s30, %s2192_s14  }
  0x1e   : > { %1337 = dma.hbm_to_vmem [thread:$0]  (!%p1911_p6), %s378_s16, 512, %s380_s26, [#allocation12], %s2190_s30, %s2190_s30, %s2192_s14  }
  0x1f   : > { %1343 = dma.hbm_to_vmem [thread:$0]  (!%p1911_p6), %s409_s20, 512, %s411_s18, [#allocation15], %s2190_s30, %s2190_s30, %s2192_s14  }
  0x20   : > { %s1244_s27 = sadd.s32 4294967294, %s1791_s24   ;;  %s1935_s13 = sadd.s32 1, %s1791_s24  }
  0x21   : > { %2217 = sst [smem:[#allocation26_spill]] %s1935_s13  ;;  %s38_s25 = ssub.s32 %s1791_s24, %s1935_s13 }
  0x22   : > { %p48_p7 = scmp.ne.s32.totalorder %s1787_s23, %s1783_s22  ;;  %p39_p8 = scmp.eq.s32.totalorder %s38_s25, 0 }
  0x23   : > { %p49_p9 = scmp.eq.s32.totalorder %s1791_s24, 0  ;;  %p54_p10 = scmp.ne.s32.totalorder %s1783_s22, %s1779_s21 }
  0x24   : > { %p319_p11 = scmp.eq.s32.totalorder %s1894_s28, 1  ;;  %p325_p2 = scmp.eq.s32.totalorder %s1244_s27, 1 }
  0x25   : > { %s1947_s16 = scalar_select %p39_p8, %s1787_s23, %s41_s19  }
  0x26   : > { %p50_p12 = por %p49_p9, %p48_p7  ;;  %p1951_p13 = por %p2203_p1, %p54_p10 }
  0x27   : > { %2218 = sst [smem:[#allocation27_spill]] %s1947_s16  ;;  %p1955_p0 = por %p319_p11, %p48_p7 }
  0x28   : > { %p1367_p4 = scmp.lt.s32.totalorder %s1791_s24, 2  ;;  %s2196_s15 = sand.u32 1, %s1787_s23  }
  0x29   : > { %s2220_s26 = scalar_select %p1955_p0, 1, 0 }
  0x2a   : > { %p1961_p5 = por %p325_p2, %p54_p10  ;;  %s1967_s19 = sshll.u32 %s2196_s15, 3 }
  0x2b   : > { %2221 = sst [smem:[#allocation28_spill]] %s2220_s26  ;;  %s1970_s25 = sshll.u32 %s1791_s24, 3 }
  0x2c   : > { %s2222_s18 = scalar_select %p1961_p5, 1, 0 }
  0x2d   : > { %p1972_p8 = pnand %p1367_p4, %p50_p12  ;;  %s457_s27 = sand.u32 1, %s1791_s24  }
  0x2e   : > { %2223 = sst [smem:[#allocation29_spill]] %s2222_s18  ;;  %s461_s10 = scalar_lea.vmem [#allocation5], %s1967_s19 }
  0x2f   : > { %s2225_s1 = sld [smem:[#allocation30_spill]]  ;;  %s469_s16 = sshll.u32 %s461_s10, 4  ;;  %s470_s16 = int_to_ptr.vmem [resolvable:$true] %s469_s16 }
  0x30   : > { %s360_s21 = sshll.u32 %s2182_s5, 4  ;;  %s1985_s26 = scalar_lea.sflag [#allocation6], %s457_s27  ;;  %s361_s21 = int_to_ptr.hbm [resolvable:$true] %s360_s21 }
  0x31   : > { %p1533_p9 = pneg %p1972_p8 }
  0x35   : > { %s465_s7 = scalar_lea.hbm %s2225_s1, %s1970_s25  ;;  %s1536_s10 = scalar_lea.hbm %s2225_s1, 16 }
  0x36   : > { %s467_s13 = sshll.u32 %s465_s7, 4  ;;  %s468_s13 = int_to_ptr.hbm [resolvable:$true] %s467_s13 }
  0x37   : > { %s1529_s12 = sshra.s32 %s468_s13, 4  ;;  %s1530_s12 = int_to_ptr.hbm [resolvable:$true] %s1529_s12 }
  0x38   : > { %s1531_s8 = scalar_lea.hbm %s1530_s12, 8  ;;  %p1537_p12 = scmp.lt.s32.totalorder %s1530_s12, %s2225_s1 }
  0x39   : > { %p1532_p7 = scmp.ne.s32.totalorder %s1530_s12, %s1531_s8  ;;  %p1538_p2 = scmp.lt.s32.totalorder %s1536_s10, %s1531_s8 }
  0x3b   : > { %p1534_p10 = pnand %p1533_p9, %p1532_p7  ;;  %p1539_p4 = por %p1538_p2, %p1537_p12 }
  0x3d   : > { %p1535_p11 = pneg %p1534_p10 }
  0x3f   : > { %p1540_p1 = pnand %p1539_p4, %p1535_p11 }
  0x41   : > { %1543 = shalt.err (!%p1540_p1)
}
  0x42   : > { %1353 = dma.hbm_to_vmem [thread:$0]  (!%p1972_p8), %s468_s13, 128, %s470_s16, %s1985_s26  }
  0x43   : > { %s1798_s15 = smov [#allocation10]   ;;  %s394_s12 = sshll.u32 %s2186_s9, 4  ;;  %s395_s12 = int_to_ptr.hbm [resolvable:$true] %s394_s12 }
  0x44   : > { %s362_s18 = sshll.u32 %s1798_s15, 4  ;;  %s2226_s8 = smov 8   ;;  %s363_s18 = int_to_ptr.vmem [resolvable:$true] %s362_s18 }
  0x45   : > { %s2227_s24 = smov 128   ;;  %s422_s13 = sshll.u32 %s2188_s11, 4  ;;  %s423_s13 = int_to_ptr.hbm [resolvable:$true] %s422_s13 }
  0x46   : > { %1334 = dma.hbm_to_vmem [thread:$0]  (!%p1911_p6), %s361_s21, 512, %s363_s18, [#allocation9], %s2227_s24, %s2227_s24, %s2226_s8  }
  0x47   : > { %s1799_s16 = smov [#allocation13]   ;;  %s1800_s15 = smov [#allocation16]  }
  0x48   : > { %s396_s14 = sshll.u32 %s1799_s16, 4  ;;  %s424_s27 = sshll.u32 %s1800_s15, 4  ;;  %s397_s14 = int_to_ptr.vmem [resolvable:$true] %s396_s14  ;;  %s425_s27 = int_to_ptr.vmem [resolvable:$true] %s424_s27 }
  0x49   : > { %1340 = dma.hbm_to_vmem [thread:$0]  (!%p1911_p6), %s395_s12, 512, %s397_s14, [#allocation12], %s2227_s24, %s2227_s24, %s2226_s8  }
  0x4a   : > { %1346 = dma.hbm_to_vmem [thread:$0]  (!%p1911_p6), %s423_s13, 512, %s425_s27, [#allocation15], %s2227_s24, %s2227_s24, %s2226_s8  }
  0x4b   : > { %s446_s3 = scalar_lea.hbm %s2177_s0, %s1970_s25  ;;  %s442_s7 = scalar_lea.vmem [#allocation2], %s1967_s19 }
  0x4c   : > { %s450_s10 = sshll.u32 %s442_s7, 4  ;;  %s448_s16 = sshll.u32 %s446_s3, 4  ;;  %s451_s10 = int_to_ptr.vmem [resolvable:$true] %s450_s10  ;;  %s449_s16 = int_to_ptr.hbm [resolvable:$true] %s448_s16 }
  0x4d   : > { %s2228_s1 = sand.u32 1, %s1787_s23   ;;  %s1649_s14 = sshra.s32 %s449_s16, 4  ;;  %s1650_s14 = int_to_ptr.hbm [resolvable:$true] %s1649_s14 }
  0x4e   : > { %s439_s12 = scalar_lea.sflag [#allocation3], %s2228_s1  ;;  %s1651_s15 = scalar_lea.hbm %s1650_s14, 8 }
  0x4f   : > { %p1652_p1 = scmp.ne.s32.totalorder %s1650_s14, %s1651_s15  ;;  %s1656_s24 = scalar_lea.hbm %s2177_s0, 16 }
  0x50   : > { %p1657_p6 = scmp.lt.s32.totalorder %s1650_s14, %s2177_s0  ;;  %p1658_p11 = scmp.lt.s32.totalorder %s1656_s24, %s1651_s15 }
  0x51   : > { %p1654_p7 = pnand %p1652_p1, %p1533_p9 }
  0x52   : > { %p1659_p12 = por %p1658_p11, %p1657_p6 }
  0x53   : > { %p1655_p10 = pneg %p1654_p7 }
  0x55   : > { %p1660_p2 = pnand %p1659_p12, %p1655_p10 }
  0x57   : > { %1663 = shalt.err (!%p1660_p2)
}
  0x58   : > { %1350 = dma.hbm_to_vmem [thread:$0]  (!%p1972_p8), %s449_s16, 128, %s451_s10, %s439_s12  }
  0x59   : > { %s484_s18 = scalar_lea.hbm %s2179_s2, %s1970_s25  ;;  %s480_s3 = scalar_lea.vmem [#allocation7], %s1967_s19 }
  0x5a   : > { %s488_s7 = sshll.u32 %s480_s3, 4  ;;  %s486_s17 = sshll.u32 %s484_s18, 4  ;;  %s489_s7 = int_to_ptr.vmem [resolvable:$true] %s488_s7  ;;  %s487_s17 = int_to_ptr.hbm [resolvable:$true] %s486_s17 }
  0x5b   : > { %s1679_s14 = sshra.s32 %s487_s17, 4  ;;  %s1686_s10 = scalar_lea.hbm %s2179_s2, 16  ;;  %s1680_s14 = int_to_ptr.hbm [resolvable:$true] %s1679_s14 }
  0x5c   : > { %s1681_s15 = scalar_lea.hbm %s1680_s14, 8  ;;  %p1687_p10 = scmp.lt.s32.totalorder %s1680_s14, %s2179_s2 }
  0x5d   : > { %p1682_p4 = scmp.ne.s32.totalorder %s1680_s14, %s1681_s15  ;;  %p1688_p6 = scmp.lt.s32.totalorder %s1686_s10, %s1681_s15 }
  0x5f   : > { %p1684_p1 = pnand %p1682_p4, %p1533_p9  ;;  %p1689_p11 = por %p1688_p6, %p1687_p10 }
  0x61   : > { %p1685_p7 = pneg %p1684_p1 }
  0x63   : > { %p1690_p12 = pnand %p1689_p11, %p1685_p7 }
  0x65   : > { %1693 = shalt.err (!%p1690_p12)
}
  0x66   : > { %1356 = dma.hbm_to_vmem [thread:$0]  (!%p1972_p8), %s487_s17, 128, %s489_s7, %s1985_s26  }
  0x67   : > { %497 = sbr.rel (%p1899_p3) target bundleno = 1051 (0x41b), region = 68  ;;  %s2060_s19 = sand.u32 (!%p1899_p3), 1, %s1783_s22  }
  0x68   : > { %s2063_s25 = sshll.u32 (!%p1899_p3), %s2060_s19, 3  ;;  %s500_s13 = scalar_lea.sflag (!%p1899_p3), [#allocation3], %s2060_s19 }
  0x69   : > { %s503_s27 = scalar_lea.vmem (!%p1899_p3), [#allocation2], %s2063_s25 }
  0x6c   : > { %1754 = dma.done.wait (%p1951_p13), %s500_s13, 128  }
  0x6d   : > { %1756 = vsyncadd (%p1951_p13), %s500_s13, 4294967168  ;;  %s509_s29 = sand.u32 1, %s1894_s28   ;;  %s513_s26 = scalar_lea.vmem [#allocation5], %s2063_s25 }
  0x6e   : > { %s510_s30 = scalar_lea.sflag [#allocation6], %s509_s29 }
  0x6f   : > { %1758 = dma.done.wait (%p1951_p13), %s510_s30, 256  }
  0x70   : > { %1760 = vsyncadd (%p1951_p13), %s510_s30, 4294967040  ;;  %s523_s1 = scalar_lea.vmem [#allocation7], %s2063_s25  ;;  %p2229_p3 = scmp.eq.s32.totalorder %s1894_s28, 0 }
  0x72   : > { %1762 = dma.done.wait (%p2229_p3), [#allocation9], 1024   ;;  %p2230_p8 = pmov %p2229_p3 }
  0x73   : > { %p2231_p9 = pmov %p2229_p3 }
  0x74   : > { %1764 = vsyncadd (%p2230_p8), [#allocation9], 4294966272 }
  0x75   : > { %1766 = dma.done.wait (%p2231_p9), [#allocation12], 1024   ;;  %p2232_p2 = pmov %p2229_p3 }
  0x77   : > { %1768 = vsyncadd (%p2232_p2), [#allocation12], 4294966272  ;;  %p2233_p4 = pmov %p2232_p2 }
  0x78   : > { %p2234_p1 = pmov %p2232_p2 }
  0x79   : > { %1770 = dma.done.wait (%p2233_p4), [#allocation15], 1024  }
  0x7a   : > { %1772 = vsyncadd (%p2234_p1), [#allocation15], 4294966272  ;;  %v643_v0 = vld [vmem:[#allocation10 + $0x18] sm:$0xff]  ;;  %v642_v2 = vld [vmem:[#allocation10 + $0x10] sm:$0xff]  ;;  %vm614_vm0 = vcmask 261120   ;;  %s1294_s18 = smul.u32 48, %s2060_s19 }
  0x7b   : > { %v676_v1 = vld [vmem:[#allocation11 + $0x18] sm:$0xff]  ;;  %663 = vmatpush.msra.mxu1 %v643_v0  ;;  %v675_v3 = vld [vmem:[#allocation11 + $0x10] sm:$0xff]  ;;  %v641_v4 = vld [vmem:[#allocation10 + $0x8] sm:$0xff]  ;;  %s2235_s15 = sld [smem:[#allocation33_spill]]  ;;  %s1801_s24 = smov 96   ;;  %vm893_vm1 = vcmask 64512  }
  0x7c   : > { %696 = vmatpush.msra.mxu2 %v676_v1  ;;  %v674_v5 = vld [vmem:[#allocation11 + $0x8] sm:$0xff]  ;;  %v609_v6 = vld [vmem:[#allocation8 + $0x18] sm:$0xff]  ;;  %v608_v7 = vld [vmem:[#allocation8 + $0x10] sm:$0xff]  ;;  %s2105_s8 = scalar_lea.vmem [#allocation17], %s1294_s18  ;;  %s1802_s10 = smov 64  }
  0x7d   : > { %664 = vmatpush.msra.mxu1 %v642_v2  ;;  %v640_v8 = vld [vmem:[#allocation10] sm:$0xff]  ;;  %630 = vmatpush.msra.mxu0 %v609_v6  ;;  %v672_v11 = vld [vmem:[%s523_s1] sm:$0xff]  ;;  %v607_v12 = vld [vmem:[#allocation8 + $0x8] sm:$0xff]  ;;  %s1295_s16 = smul.u32 48, %s1894_s28  ;;  %s2236_s13 = sld [smem:[#allocation35_spill]] }
  0x7e   : > { %697 = vmatpush.msra.mxu2 %v675_v3  ;;  %v673_v9 = vld [vmem:[#allocation11] sm:$0xff]  ;;  %v605_v14 = vld [vmem:[%s503_s27] sm:$0xff]  ;;  %v733_v17 = vld [vmem:[#allocation14 + $0x8] sm:$0xff]  ;;  %s1068_s30 = sshll.u32 %s2105_s8, 4  ;;  %s1056_s1 = scalar_lea.sflag [#allocation4], %s2060_s19  ;;  %s1069_s30 = int_to_ptr.vmem [resolvable:$true] %s1068_s30 }
  0x7f   : > { %665 = vmatpush.msra.mxu1 %v641_v4  ;;  %v639_v10 = vld [vmem:[%s513_s26] sm:$0xff]  ;;  %631 = vmatpush.msra.mxu0 %v608_v7  ;;  %v735_v15 = vld [vmem:[#allocation14 + $0x18] sm:$0xff]  ;;  %v734_v16 = vld [vmem:[#allocation14 + $0x10] sm:$0xff] }
  0x80   : > { %698 = vmatpush.msra.mxu2 %v674_v5  ;;  %v606_v13 = vld [vmem:[#allocation8] sm:$0xff]  ;;  %v762_v19 = vld [vmem:[#allocation16 + $0x18] sm:$0xff]  ;;  %v761_v21 = vld [vmem:[#allocation16 + $0x10] sm:$0xff] }
  0x81   : > { %666 = vmatpush.msra.mxu1 %v640_v8  ;;  %632 = vmatpush.msra.mxu0 %v607_v12  ;;  %v732_v18 = vld [vmem:[#allocation14] sm:$0xff]  ;;  %v708_v20 = vld [vmem:[#allocation13 + $0x18] sm:$0xff]  ;;  %v707_v22 = vld [vmem:[#allocation13 + $0x10] sm:$0xff] }
  0x82   : > { %699 = vmatpush.msra.mxu2 %v673_v9  ;;  %1270 = vmatmul.msk.f32.vlgmr.msra.gmra.mxu1 %vm614_vm0, %v639_v10  ;;  %v760_v23 = vld [vmem:[#allocation16 + $0x8] sm:$0xff]  ;;  %v759_v25 = vld [vmem:[#allocation16] sm:$0xff]  ;;  %v1424_v27 = vld [vmem:[%s2183_s6] ss:$0 sm:$0xff] }
  0x83   : > { %1271 = vmatmul.msk.f32.vlgmr.msra.gmra.mxu2 %vm614_vm0, %v672_v11  ;;  %633 = vmatpush.msra.mxu0 %v606_v13  ;;  %v706_v24 = vld [vmem:[#allocation13 + $0x8] sm:$0xff]  ;;  %v705_v26 = vld [vmem:[#allocation13] sm:$0xff]  ;;  %v1426_v30 = vld [vmem:[%s2181_s4] ss:$0 sm:$0xff]  ;;  %s1067_s27 = scalar_lea.hbm %s2236_s13, %s1295_s16  ;;  %s1729_s3 = scalar_lea.hbm %s2236_s13, 96 }
  0x84   : > { %1269 = vmatmul.msk.f32.vlgmr.msra.gmra.mxu0 %vm614_vm0, %v605_v14  ;;  %778 = vmatpush.msrb.mxu1 %v762_v19  ;;  %v1425_v32 = vld [vmem:[%s2235_s15] ss:$0 sm:$0xff]  ;;  %s1070_s26 = sshll.u32 %s1067_s27, 4  ;;  %s1071_s26 = int_to_ptr.hbm [resolvable:$true] %s1070_s26 }
  0x85   : > { %751 = vmatpush.msrb.mxu0 %v735_v15  ;;  %724 = vmatpush.msra.mxu3 %v708_v20  ;;  %s1723_s28 = sshra.s32 %s1071_s26, 4  ;;  %s1724_s28 = int_to_ptr.hbm [resolvable:$true] %s1723_s28 }
  0x86   : > { %779 = vmatpush.msrb.mxu1 %v761_v21  ;;  %s1725_s20 = scalar_lea.hbm %s1724_s28, 48  ;;  %p1730_p6 = scmp.lt.s32.totalorder %s1724_s28, %s2236_s13 }
  0x87   : > { %752 = vmatpush.msrb.mxu0 %v734_v16  ;;  %725 = vmatpush.msra.mxu3 %v707_v22  ;;  %p1726_p13 = scmp.ne.s32.totalorder %s1724_s28, %s1725_s20  ;;  %p1731_p11 = scmp.lt.s32.totalorder %s1729_s3, %s1725_s20 }
  0x88   : > { %780 = vmatpush.msrb.mxu1 %v760_v23 }
  0x89   : > { %753 = vmatpush.msrb.mxu0 %v733_v17  ;;  %726 = vmatpush.msra.mxu3 %v706_v24  ;;  %p1727_p7 = pnand %p1726_p13, %p1955_p0  ;;  %p1732_p12 = por %p1731_p11, %p1730_p6 }
  0x8a   : > { %781 = vmatpush.msrb.mxu1 %v759_v25 }
  0x8b   : > { %754 = vmatpush.msrb.mxu0 %v732_v18  ;;  %727 = vmatpush.msra.mxu3 %v705_v26  ;;  %p1728_p10 = pneg %p1727_p7 }
  0x8d   : > { %p1733_p3 = pnand %p1732_p12, %p1728_p10 }
  0xff   : > { %v668_v28 = vpop.f32.mrf.mxu1 }
 0x100   : > { %v669_v29 = vadd.f32 %v1424_v27, %v668_v28 }
 0x101   : > { %v635_v33 = vpop.f32.mrf.mxu0 }
 0x102   : > { %v671_v31 = vmax.f32 %v669_v29, 0.0  ;;  %v636_v34 = vadd.f32 %v1426_v30, %v635_v33 }
 0x104   : > { %1289 = vst.msk [vmem:[%s2105_s8 + $0x20] sm:$0xff] %vm614_vm0, %v671_v31  ;;  %1273 = vmatmul.msk.f32.vlgmr.msrb.gmra.mxu0 %vm614_vm0, %v671_v31  ;;  %v638_v37 = vmax.f32 %v636_v34, 0.0 }
 0x106   : > { %v701_v35 = vpop.f32.mrf.mxu2  ;;  %1288 = vst.msk [vmem:[%s2105_s8 + $0x18] sm:$0xff] %vm614_vm0, %v638_v37  ;;  %1272 = vmatmul.msk.f32.vlgmr.msra.gmra.mxu3 %vm614_vm0, %v638_v37 }
 0x107   : > { %v702_v36 = vadd.f32 %v1425_v32, %v701_v35 }
 0x109   : > { %v704_v38 = vmax.f32 %v702_v36, 0.0 }
 0x10b   : > { %1290 = vst.msk [vmem:[%s2105_s8 + $0x28] sm:$0xff] %vm614_vm0, %v704_v38  ;;  %1274 = vmatmul.msk.f32.vlgmr.msrb.gmra.mxu1 %vm614_vm0, %v704_v38 }
 0x181   : > { %v756_v39 = vpop.f32.mrf.mxu0 }
 0x182   : > { %843 = vrot.lane.b32.xlu1 %v756_v39, %s1801_s24 }
 0x188   : > { %v783_v40 = vpop.f32.mrf.mxu1 }
 0x189   : > { %787 = vrot.lane.b32.xlu0 %v783_v40, %s1801_s24  ;;  %v729_v41 = vpop.f32.mrf.mxu3  ;;  %v814_v45 = vadd.f32 %v783_v40, %v756_v39 }
 0x18a   : > { %v1419_v7 = vpack.i.bf16 %v756_v39, %v729_v41 }
 0x191   : > { %815 = vrot.lane.b32.xlu0 %v729_v41, %s1801_s24 }
 0x1f4   : > { %v844_v42 = vpop.permute.xlu1 %843 }
 0x1f5   : > { %1279 = vmatpush.xpose.msk.msra.mxu0 %vm614_vm0, %v844_v42 }
 0x1f8   : > { %1280 = vmatmul.msk.f32.vlgmr.msra.gmra.mxu0 %vm614_vm0, %v783_v40 }
 0x1fb   : > { %v788_v43 = vpop.permute.xlu0 %787 }
 0x1fc   : > { %1275 = vmatpush.xpose.msk.msrb.mxu2 %vm614_vm0, %v788_v43  ;;  %1281 = vmatpush.xpose.msk.msra.mxu1 %vm614_vm0, %v788_v43 }
 0x1ff   : > { %1276 = vmatmul.msk.f32.vlgmr.msrb.gmra.mxu2 %vm614_vm0, %v729_v41  ;;  %1282 = vmatmul.msk.f32.vlgmr.msra.gmra.mxu1 %vm614_vm0, %v756_v39 }
 0x203   : > { %v816_v44 = vpop.permute.xlu0 %815 }
 0x204   : > { %1277 = vmatpush.xpose.msk.msrb.mxu3 %vm614_vm0, %v816_v44 }
 0x207   : > { %1278 = vmatmul.msk.f32.vlgmr.msrb.gmra.mxu3 %vm614_vm0, %v814_v45 }
 0x275   : > { %v866_v46 = vpop.f32.mrf.mxu0 }
 0x27c   : > { %v889_v50 = vpop.f32.mrf.mxu1 }
 0x282   : > { %v811_v47 = vpop.f32.mrf.mxu2 }
 0x283   : > { %v869_v48 = vadd.f32 %v866_v46, %v811_v47  ;;  %v892_v51 = vadd.f32 %v889_v50, %v811_v47 }
 0x285   : > { %v944_v49 = vsel %vm893_vm1, %v869_v48, -inf  ;;  %v994_v54 = vsel %vm893_vm1, %v892_v51, -inf }
 0x286   : > { %945 = vmax.xlane.f32.xlu2 %v944_v49 }
 0x28a   : > { %v839_v52 = vpop.f32.mrf.mxu3 }
 0x28b   : > { %v894_v53 = vsel %vm893_vm1, %v839_v52, -inf }
 0x28c   : > { %895 = vmax.xlane.f32.xlu1 %v894_v53 }
 0x28e   : > { %995 = vmax.xlane.f32.xlu2 %v994_v54 }
 0x2a5   : > { %1018 = vrot.lane.b32.xlu1 %v783_v40, %s1802_s10 }
 0x2f9   : > { %v946_v55 = vpop.xlane.xlu2 %945 }
 0x2fa   : > { %v947_v56 = vsub.f32 %v869_v48, %v946_v55 }
 0x2fc   : > { %v948_v57 = vmul.f32 1.442695, %v947_v56 }
 0x2fe   : > { %1427 = vpow2.f32 %v948_v57 }
 0x2ff   : > { %v896_v58 = vpop.xlane.xlu1 %895 }
 0x300   : > { %v897_v59 = vsub.f32 %v839_v52, %v896_v58 }
 0x301   : > { %v996_v60 = vpop.xlane.xlu2 %995 }
 0x302   : > { %v898_v61 = vmul.f32 1.442695, %v897_v59  ;;  %v997_v62 = vsub.f32 %v892_v51, %v996_v60 }
 0x304   : > { %v1428_v63 = vpop.eup %1427  ;;  %1429 = vpow2.f32 %v898_v61  ;;  %v998_v0 = vmul.f32 1.442695, %v997_v62 }
 0x305   : > { %v950_v1 = vsel %vm893_vm1, %v1428_v63, 0.0 }
 0x306   : > { %1431 = vpow2.f32 %v998_v0  ;;  %951 = vadd.xlane.f32.xlu2 %v950_v1 }
 0x30a   : > { %v1430_v2 = vpop.eup %1429 }
 0x30b   : > { %v900_v3 = vsel %vm893_vm1, %v1430_v2, 0.0 }
 0x30c   : > { %v2129_v4 = vpop.eup %1431  ;;  %901 = vadd.xlane.f32.xlu0 %v900_v3 }
 0x30d   : > { %v1000_v5 = vsel %vm893_vm1, %v2129_v4, 0.0 }
 0x30e   : > { %1001 = vadd.xlane.f32.xlu2 %v1000_v5 }
 0x317   : > { %v1019_v6 = vpop.permute.xlu1 %1018 }
 0x318   : > { %1039 = vmatpush.msrb.mxu0 %v1019_v6 }
 0x326   : > { %1420 = vrot.lane.b32.xlu2 %v1419_v7, %s1802_s10 }
 0x379   : > { %v952_v8 = vpop.xlane.xlu2 %951 }
 0x37a   : > { %1433 = vrcp.f32 %v952_v8  ;;  %v962_v14 = vand.u32 2147483647, %v952_v8  ;;  %v964_v15 = vand.u32 2147483648, %v952_v8  ;;  %vm958_vm3 = vweird.f32 %v952_v8 }
 0x37c   : > { %vm963_vm5 = vcmp.eq.f32.partialorder %v962_v14, 8.507059e+37  ;;  %v965_v21 = vor.u32 1.1754944e-38, %v964_v15 }
 0x37f   : > { %v902_v9 = vpop.xlane.xlu0 %901 }
 0x380   : > { %v1434_v10 = vpop.eup %1433  ;;  %1435 = vrcp.f32 %v902_v9  ;;  %v912_v24 = vand.u32 2147483647, %v902_v9  ;;  %v914_v28 = vand.u32 2147483648, %v902_v9  ;;  %vm908_vm7 = vweird.f32 %v902_v9 }
 0x381   : > { %v954_v11 = vmul.f32 %v1434_v10, %v952_v8  ;;  %v1002_v12 = vpop.xlane.xlu2 %1001  ;;  %vm959_vm2 = vweird.f32 %v1434_v10 }
 0x382   : > { %1437 = vrcp.f32 %v1002_v12  ;;  %vm960_vm4 = vmor %vm958_vm3, %vm959_vm2  ;;  %v1014_v34 = vand.u32 2147483648, %v1002_v12  ;;  %v1012_v37 = vand.u32 2147483647, %v1002_v12  ;;  %v915_v38 = vor.u32 1.1754944e-38, %v914_v28 }
 0x383   : > { %v955_v13 = vsub.f32 1.0, %v954_v11  ;;  %vm913_vm10 = vcmp.eq.f32.partialorder %v912_v24, 8.507059e+37  ;;  %vm1008_vm11 = vweird.f32 %v1002_v12 }
 0x384   : > { %v1015_v42 = vor.u32 1.1754944e-38, %v1014_v34  ;;  %vm1013_vm13 = vcmp.eq.f32.partialorder %v1012_v37, 8.507059e+37 }
 0x385   : > { %v956_v16 = vmul.f32 %v1434_v10, %v955_v13 }
 0x386   : > { %v1436_v17 = vpop.eup %1435 }
 0x387   : > { %v957_v18 = vadd.f32 %v1434_v10, %v956_v16  ;;  %v904_v19 = vmul.f32 %v1436_v17, %v902_v9  ;;  %vm909_vm6 = vweird.f32 %v1436_v17 }
 0x388   : > { %v1438_v20 = vpop.eup %1437  ;;  %vm910_vm9 = vmor %vm908_vm7, %vm909_vm6 }
 0x389   : > { %v961_v22 = vsel %vm960_vm4, %v1434_v10, %v957_v18  ;;  %v905_v23 = vsub.f32 1.0, %v904_v19  ;;  %v1004_v25 = vmul.f32 %v1438_v20, %v1002_v12  ;;  %v1421_v26 = vpop.permute.xlu2 %1420  ;;  %vm1009_vm8 = vweird.f32 %v1438_v20 }
 0x38a   : > { %v966_v27 = vsel %vm963_vm5, %v965_v21, %v961_v22  ;;  %v1423_v29 = vunpack.i.h.bf16 %v1421_v26  ;;  %v1422_v30 = vunpack.i.l.bf16 %v1421_v26  ;;  %vm1010_vm12 = vmor %vm1008_vm11, %vm1009_vm8 }
 0x38b   : > { %v906_v31 = vmul.f32 %v1436_v17, %v905_v23  ;;  %v1005_v32 = vsub.f32 1.0, %v1004_v25  ;;  %v967_v33 = vmul.f32 %v1428_v63, %v966_v27 }
 0x38c   : > { %939 = vmatpush.msra.mxu2 %v1422_v30  ;;  %989 = vmatpush.msra.mxu3 %v1423_v29 }
 0x38d   : > { %v907_v35 = vadd.f32 %v1436_v17, %v906_v31  ;;  %v1006_v36 = vmul.f32 %v1438_v20, %v1005_v32  ;;  %1284 = vmatmul.msk.f32.vlgmr.msra.gmra.mxu3 %vm893_vm1, %v967_v33 }
 0x38f   : > { %v911_v39 = vsel %vm910_vm9, %v1436_v17, %v907_v35  ;;  %v1007_v40 = vadd.f32 %v1438_v20, %v1006_v36 }
 0x390   : > { %v916_v41 = vsel %vm913_vm10, %v915_v38, %v911_v39 }
 0x391   : > { %v917_v43 = vmul.f32 %v1430_v2, %v916_v41  ;;  %v1011_v44 = vsel %vm1010_vm12, %v1438_v20, %v1007_v40 }
 0x392   : > { %v1016_v45 = vsel %vm1013_vm13, %v1015_v42, %v1011_v44 }
 0x393   : > { %1283 = vmatmul.msk.f32.vlgmr.msra.gmra.mxu2 %vm893_vm1, %v917_v43  ;;  %v1017_v46 = vmul.f32 %v2129_v4, %v1016_v45 }
 0x395   : > { %1285 = vmatmul.msk.f32.vlgmr.msrb.gmra.mxu0 %vm893_vm1, %v1017_v46 }
 0x410   : > { %v991_v47 = vpop.f32.mrf.mxu3 }
 0x411   : > { %1286 = vst.msk [vmem:[%s2105_s8 + $0x8] sm:$0xff] %vm614_vm0, %v991_v47 }
 0x412   : > { %v1041_v48 = vpop.f32.mrf.mxu0 }
 0x413   : > { %1287 = vst.msk [vmem:[%s2105_s8 + $0x10] sm:$0xff] %vm614_vm0, %v1041_v48 }
 0x416   : > { %v941_v49 = vpop.f32.mrf.mxu2 }
 0x417   : > { %1044 = vst.msk [vmem:[%s2105_s8] sm:$0xff] %vm614_vm0, %v941_v49 }
 0x418   : > { %1736 = shalt.err (!%p1733_p3)
}
 0x419   : > { %s1803_s19 = smov 128   ;;  %s1804_s14 = smov 8  }
 0x41a   : > { %1326 = dma.vmem_to_hbm [thread:$0]  (%p1955_p0), %s1069_s30, 768, %s1071_s26, %s1056_s1, %s1803_s19, %s1803_s19, %s1804_s14  }
 0x41b PF: > { %s2238_s15 = sld [smem:[#allocation24_spill]] }
 0x41c   : > { %s2240_s24 = sld [smem:[#allocation25_spill]] }
 0x421   : > { %s1085_s10 = sand.u32 1, %s2238_s15  }
 0x422   : > { %p2241_p8 = scmp.ge.s32.totalorder %s2240_s24, 2  ;;  %s1086_s16 = scalar_lea.sflag [#allocation4], %s1085_s10 }
 0x424   : > { %p1358_p9 = pnand %p2241_p8, %p1961_p5 }
 0x426   : > { %p1359_p2 = pneg %p1358_p9 }
 0x428   : > { %1774 = dma.done.wait (%p1359_p2), %s1086_s16, 768  }
 0x429   : > { %1776 = vsyncadd (%p1359_p2), %s1086_s16, 4294966528  ;;  %s2242_s24 = sld [smem:[#allocation26_spill]]  ;;  %s2244_s21 = smov %s1783_s22 }
 0x42a   : > { %s2243_s12 = sld [smem:[#allocation27_spill]]  ;;  %s2245_s22 = smov %s1787_s23 }
 0x42f   : > { %p31_p4 = scmp.ge.s32.totalorder %s2242_s24, 4  }
 0x430   : > { %s2246_s23 = smov %s2243_s12 }
 0x431   :  { %33 = sbr.rel (!%p31_p4) target bundleno = 17 (0x11), region = 166 }
 0x436   :  { %1092 = vsyncpa [#allocation3], 1 }
 0x437   :  { %1094 = vsyncpa [#allocation3 + $0x1], 1 }
 0x438   :  { %1095 = vsyncpa [#allocation6], 1 }
 0x439   :  { %1097 = vsyncpa [#allocation6 + $0x1], 1 }
 0x43a   :  { %1098 = vsyncpa [#allocation9], 1 }
 0x43b   :  { %1099 = vsyncpa [#allocation12], 1 }
 0x43c   :  { %1100 = vsyncpa [#allocation15], 1 }
 0x43d   :  { %1101 = vsyncpa [#allocation4], 1 }
 0x43e   :  { %1103 = vsyncpa [#allocation4 + $0x1], 1 }

</bundles_post_ra>
